<compile_context>
chip_gen: v6e
topology: v6e:2x2x1
jax: 0.10.0
libtpu: 0.0.40
codegen_flags: <defaults>
</compile_context>

<pallas_src>
import jax
import jax.numpy as jnp
from jax.experimental import pallas as pl
from jax.experimental.pallas import tpu as pltpu

NEG_SLOPE = 0.2                  # LeakyReLU negative slope
COMPUTE_DTYPE = jnp.bfloat16     # MXU operand dtype; accumulation stays f32


def _leaky_relu(x):
    return jnp.where(x > 0, x, NEG_SLOPE * x)


def _conv3_lrelu(x, first_row, last_row, wcat, bias):
    """k=3 'SAME' Conv1d over flattened (B_tile*W, Cin) rows as a single MXU matmul.

    x         : (M, Cin) f32, M = B_tile*W (rows ordered b*W + w)
    first_row : (M, 1) bool, rows where (row % W) == 0
    last_row  : (M, 1) bool, rows where (row % W) == W-1
    wcat      : (3*Cin, Cout) bf16, tap-major ordering [x[w-1] | x[w] | x[w+1]]
    bias      : (1, Cout) f32
    """
    m = x.shape[0]
    # Shifted taps via XLU sublane rotations; mask rows that wrapped across a
    # sample boundary (or the array boundary).
    x_m1 = jnp.where(first_row, 0.0, pltpu.roll(x, 1, axis=0))       # x[w-1]
    x_p1 = jnp.where(last_row, 0.0, pltpu.roll(x, m - 1, axis=0))    # x[w+1] (roll by -1)
    xcol = jnp.concatenate([x_m1, x, x_p1], axis=-1).astype(COMPUTE_DTYPE)  # (M, 3*Cin)
    y = jnp.dot(xcol, wcat, preferred_element_type=jnp.float32) + bias
    return _leaky_relu(y)


def _make_trunk_kernel(num_blocks, wlen):
    """Fused kernel: `num_blocks` DiscriminatorBlocks + their 1x1 extract convs."""

    def kernel(*refs):
        x_ref = refs[0]
        w_refs = refs[1:1 + 6 * num_blocks]
        out_refs = refs[1 + 6 * num_blocks:1 + 7 * num_blocks]
        g_scr = refs[1 + 7 * num_blocks:]

        # bf16 HBM input, upcast once; all elementwise math stays f32 (v5e VPU).
        x = x_ref[...].astype(jnp.float32)                     # (B_tile*W, Cin)
        w_cur = wlen                                           # per-sample width
        for j in range(num_blocks):
            w1, b1, w2, b2, we_t, be = w_refs[6 * j:6 * j + 6]
            m = x.shape[0]                                     # B_tile * w_cur

            # Boundary masks hoisted once per block (shared by both convs).
            ridx = jax.lax.broadcasted_iota(jnp.int32, (m, 1), 0)
            rw = ridx % w_cur
            first_row = rw == 0
            last_row = rw == (w_cur - 1)

            h = _conv3_lrelu(x, first_row, last_row, w1[...], b1[...])
            g = _conv3_lrelu(h, first_row, last_row, w2[...], b2[...])

            # AvgPool1d(2): W is even so rows 2k / 2k+1 never straddle a sample.
            # The *0.5 is folded into we_t and the next block's w1 at trace time.
            g_scr[j][...] = g
            mo = m // 2
            pooled = (g_scr[j][pl.ds(0, mo, stride=2), :] +
                      g_scr[j][pl.ds(1, mo, stride=2), :])     # (Mo, Cout) f32, unscaled

            # 1x1 extract conv, emitted lane-dense as (E, B_tile*W_out) (packed NCW).
            e = jax.lax.dot_general(
                we_t[...], pooled.astype(COMPUTE_DTYPE),
                dimension_numbers=(((1,), (1,)), ((), ())),
                preferred_element_type=jnp.float32) + be[...]
            out_refs[j][0] = e.astype(jnp.float32)

            x = pooled                                         # feeds next block
            w_cur //= 2

    return kernel


def _const_index_map(ndim):
    zeros = (0,) * ndim
    return lambda i: zeros


def _pick_batch_tile(n, wlen):
    """Largest divisor of n with B_tile*W <= ~256 rows, keeping >=2 grid steps
    whenever n >= 2 (v7x has 2 TensorCores fed via the parallel grid axis), and
    keeping the input block's sublane dim a multiple of 8 (BlockSpec rule)."""
    best = 1
    for d in range(1, n + 1):
        if n % d != 0:
            continue
        if d > 1 and d * wlen > 256:
            continue
        if n >= 2 and n // d < 2:
            continue
        if d != n and (d * wlen) % 8 != 0:
            continue
        best = max(best, d)
    return best


def transform_network_forward(x_ncw, params):
    """Forward pass of TransformNetwork.

    x_ncw : (N, C, W) like the PyTorch Conv1d input.
    Returns a list of extract outputs in PyTorch NCW layout:
      [(N, extract_dim, W/2), (N, extract_dim, W/4), ...].
    """
    n, cin, wlen = x_ncw.shape
    num_blocks = len(params)
    assert wlen % (2 ** num_blocks) == 0, "W must be divisible by 2**num_blocks"

    b_tile = _pick_batch_tile(n, wlen)
    grid = n // b_tile

    # (N, C, W) -> flattened (N*W, C); bf16 since it is only an MXU operand.
    x = jnp.transpose(x_ncw, (0, 2, 1)).astype(COMPUTE_DTYPE).reshape(n * wlen, cin)

    flat_in = [x]
    in_specs = [pl.BlockSpec((b_tile * wlen, cin), lambda i: (i, 0))]
    out_shapes, out_specs, scratch = [], [], []
    vmem_bytes = 2 * b_tile * wlen * cin * 2          # double-buffered bf16 input block

    w_j = wlen
    for j, p in enumerate(params):
        c_in = p["w1"].shape[1]
        c_mid = p["w1"].shape[2]
        c_out = p["w2"].shape[2]
        e_dim = p["we"].shape[1]

        # Fold the previous block's AvgPool *0.5 into this block's first conv and this
        # block's AvgPool *0.5 into its extract weights (exact: power-of-two scale).
        in_scale = 0.5 if j > 0 else 1.0
        w1c = (in_scale * p["w1"]).reshape(3 * c_in, c_mid).astype(COMPUTE_DTYPE)
        b1 = p["b1"].reshape(1, c_mid).astype(jnp.float32)
        w2c = p["w2"].reshape(3 * c_mid, c_out).astype(COMPUTE_DTYPE)
        b2 = p["b2"].reshape(1, c_out).astype(jnp.float32)
        we_t = (0.5 * p["we"]).T.astype(COMPUTE_DTYPE)         # (E, Cout), pool folded
        be = p["be"].reshape(e_dim, 1).astype(jnp.float32)

        for arr in (w1c, b1, w2c, b2, we_t, be):
            flat_in.append(arr)
            in_specs.append(pl.BlockSpec(arr.shape, _const_index_map(arr.ndim)))
            vmem_bytes += 2 * arr.size * arr.dtype.itemsize

        m_out = b_tile * (w_j // 2)
        out_shapes.append(jax.ShapeDtypeStruct((grid, e_dim, m_out), jnp.float32))
        out_specs.append(pl.BlockSpec((1, e_dim, m_out), lambda i: (i, 0, 0)))
        scratch.append(pltpu.VMEM((b_tile * w_j, c_out), jnp.float32))
        vmem_bytes += 2 * e_dim * m_out * 4 + b_tile * w_j * c_out * 4
        w_j //= 2

    # VMEM budget from actual buffer sizes, clamped so it is safe on v7x (64 MiB).
    vmem_limit = int(min(max(2 * vmem_bytes, 8 << 20), 48 << 20))

    outs = pl.pallas_call(
        _make_trunk_kernel(num_blocks, wlen),
        grid=(grid,),
        in_specs=in_specs,
        out_specs=tuple(out_specs),
        out_shape=tuple(out_shapes),
        scratch_shapes=scratch,
        compiler_params=pltpu.CompilerParams(
            dimension_semantics=("parallel",),
            vmem_limit_bytes=vmem_limit),
    )(*flat_in)

    # Unpack lane-dense (grid, E, B_tile*Wo) -> PyTorch NCW (N, E, Wo).
    results = []
    w_j = wlen
    for o in outs:
        wo = w_j // 2
        e_dim = o.shape[1]
        r = o.reshape(grid, e_dim, b_tile, wo).transpose(0, 2, 1, 3).reshape(n, e_dim, wo)
        results.append(r)
        w_j = wo
    return results


# ----------------------------- parameter init --------------------------------
def init_params(key, num_input_channels, block_channels, extract_dim):
    """Conv weights stored as (K, Cin, Cout) == torch weight.permute(2, 1, 0)."""
    channels = [num_input_channels] + list(block_channels)
    params = []
    for cin, cout in zip(channels[:-1], channels[1:]):
        key, k1, k2, k3, k4, k5, k6 = jax.random.split(key, 7)
        s1 = 1.0 / jnp.sqrt(3.0 * cin)
        s2 = 1.0 / jnp.sqrt(3.0 * cout)
        s3 = 1.0 / jnp.sqrt(1.0 * cout)
        params.append(dict(
            w1=(s1 * jax.random.normal(k1, (3, cin, cout))).astype(jnp.float32),
            b1=(0.1 * jax.random.normal(k4, (cout,))).astype(jnp.float32),
            w2=(s2 * jax.random.normal(k2, (3, cout, cout))).astype(jnp.float32),
            b2=(0.1 * jax.random.normal(k5, (cout,))).astype(jnp.float32),
            we=(s3 * jax.random.normal(k3, (cout, extract_dim))).astype(jnp.float32),
            be=(0.1 * jax.random.normal(k6, (extract_dim,))).astype(jnp.float32),
        ))
    return params


# ----------------------------- pure-JAX reference -----------------------------
def _ref_forward(x_ncw, params):
    """Standard (unfolded) semantics: bf16 matmul operands, f32 accumulation."""
    x = jnp.transpose(x_ncw, (0, 2, 1)).astype(jnp.float32)     # (N, W, C)
    outs = []
    for p in params:
        def conv1d(a, w, b):
            y = jax.lax.conv_general_dilated(
                a.astype(COMPUTE_DTYPE), w.astype(COMPUTE_DTYPE),
                window_strides=(1,), padding="SAME",
                dimension_numbers=("NWC", "WIO", "NWC"),
                preferred_element_type=jnp.float32)
            return y + b.reshape(1, 1, -1)
        h = _leaky_relu(conv1d(x, p["w1"], p["b1"]))
        g = _leaky_relu(conv1d(h, p["w2"], p["b2"]))
        n, wlen, c = g.shape
        pooled = g.reshape(n, wlen // 2, 2, c).mean(axis=2)
        e = jnp.einsum("nwc,ce->nwe",
                       pooled.astype(COMPUTE_DTYPE), p["we"].astype(COMPUTE_DTYPE),
                       preferred_element_type=jnp.float32) + p["be"].reshape(1, 1, -1)
        outs.append(jnp.transpose(e, (0, 2, 1)))                # NCW (N, E, Wo)
        x = pooled
    return outs


if __name__ == "__main__":
    key = jax.random.PRNGKey(0)
    key, kx, kp = jax.random.split(key, 3)

    # Small shapes: batch=4 (exercises batch folding: B_tile=2, grid=2),
    # input channels=4, sequence length=16, block_channels=[8, 16], extract_dim=8.
    num_input_channels = 4
    block_channels = [8, 16]
    extract_dim = 8
    N, W = 4, 16

    x = jax.random.normal(kx, (N, num_input_channels, W), dtype=jnp.float32)
    params = init_params(kp, num_input_channels, block_channels, extract_dim)

    fwd = jax.jit(transform_network_forward)
    outs = fwd(x, params)
    outs = [jax.block_until_ready(o) for o in outs]

    refs = _ref_forward(x, params)
    expected_shapes = [(N, extract_dim, W // 2), (N, extract_dim, W // 4)]
    for o, r, s in zip(outs, refs, expected_shapes):
        assert o.shape == s, (o.shape, s)
        err = float(jnp.max(jnp.abs(o - r)))
        assert jnp.allclose(o, r, atol=1e-3, rtol=1e-3), ("mismatch vs reference", err)

    print("KERNEL_OK")
</pallas_src>

<mosaic_0001>
module attributes {stable_mosaic.version = 11 : i64} {
  func.func @kernel(%arg0: i32, %arg1: memref<32x4xbf16, #tpu.memory_space<vmem>>, %arg2: memref<12x8xbf16, #tpu.memory_space<vmem>>, %arg3: memref<1x8xf32, #tpu.memory_space<vmem>>, %arg4: memref<24x8xbf16, #tpu.memory_space<vmem>>, %arg5: memref<1x8xf32, #tpu.memory_space<vmem>>, %arg6: memref<8x8xbf16, #tpu.memory_space<vmem>>, %arg7: memref<8x1xf32, #tpu.memory_space<vmem>>, %arg8: memref<24x16xbf16, #tpu.memory_space<vmem>>, %arg9: memref<1x16xf32, #tpu.memory_space<vmem>>, %arg10: memref<48x16xbf16, #tpu.memory_space<vmem>>, %arg11: memref<1x16xf32, #tpu.memory_space<vmem>>, %arg12: memref<8x16xbf16, #tpu.memory_space<vmem>>, %arg13: memref<8x1xf32, #tpu.memory_space<vmem>>, %arg14: memref<1x8x16xf32, #tpu.memory_space<vmem>>, %arg15: memref<1x8x8xf32, #tpu.memory_space<vmem>>, %arg16: memref<32x8xf32, #tpu.memory_space<vmem>>, %arg17: memref<16x16xf32, #tpu.memory_space<vmem>>) attributes {dimension_semantics = [#tpu.dimension_semantics<parallel>], iteration_bounds = array<i64: 2>, scalar_prefetch = 0 : i64, scratch_operands = 2 : i64, tpu.core_type = #tpu.core_type<tc>, window_params = [{transform_indices = @transform_0, window_bounds = array<i64: 32, 4>}, {pipeline_mode = #tpu.pipeline_mode<synchronous>, transform_indices = @transform_1, window_bounds = array<i64: 12, 8>}, {pipeline_mode = #tpu.pipeline_mode<synchronous>, transform_indices = @transform_2, window_bounds = array<i64: 1, 8>}, {pipeline_mode = #tpu.pipeline_mode<synchronous>, transform_indices = @transform_3, window_bounds = array<i64: 24, 8>}, {pipeline_mode = #tpu.pipeline_mode<synchronous>, transform_indices = @transform_4, window_bounds = array<i64: 1, 8>}, {pipeline_mode = #tpu.pipeline_mode<synchronous>, transform_indices = @transform_5, window_bounds = array<i64: 8, 8>}, {pipeline_mode = #tpu.pipeline_mode<synchronous>, transform_indices = @transform_6, window_bounds = array<i64: 8, 1>}, {pipeline_mode = #tpu.pipeline_mode<synchronous>, transform_indices = @transform_7, window_bounds = array<i64: 24, 16>}, {pipeline_mode = #tpu.pipeline_mode<synchronous>, transform_indices = @transform_8, window_bounds = array<i64: 1, 16>}, {pipeline_mode = #tpu.pipeline_mode<synchronous>, transform_indices = @transform_9, window_bounds = array<i64: 48, 16>}, {pipeline_mode = #tpu.pipeline_mode<synchronous>, transform_indices = @transform_10, window_bounds = array<i64: 1, 16>}, {pipeline_mode = #tpu.pipeline_mode<synchronous>, transform_indices = @transform_11, window_bounds = array<i64: 8, 16>}, {pipeline_mode = #tpu.pipeline_mode<synchronous>, transform_indices = @transform_12, window_bounds = array<i64: 8, 1>}, {transform_indices = @transform_13, window_bounds = array<i64: 1, 8, 16>}, {transform_indices = @transform_14, window_bounds = array<i64: 1, 8, 8>}]} {
    %c0 = arith.constant 0 : index
    %c0_0 = arith.constant 0 : index
    %0 = vector.load %arg1[%c0, %c0_0] : memref<32x4xbf16, #tpu.memory_space<vmem>>, vector<32x4xbf16>
    %1 = arith.extf %0 : vector<32x4xbf16> to vector<32x4xf32>
    %2 = tpu.iota {dimensions = array<i32: 0>} : vector<32x1xi32>
    %c16_i32 = arith.constant 16 : i32
    %c0_i32 = arith.constant 0 : i32
    %3 = arith.cmpi eq, %c16_i32, %c0_i32 : i32
    %c1_i32 = arith.constant 1 : i32
    %4 = arith.select %3, %c1_i32, %c16_i32 : i32
    %5 = vector.broadcast %4 : i32 to vector<32x1xi32>
    %6 = arith.remsi %2, %5 : vector<32x1xi32>
    %c0_i32_1 = arith.constant 0 : i32
    %7 = vector.broadcast %c0_i32_1 : i32 to vector<32x1xi32>
    %8 = arith.cmpi ne, %6, %7 : vector<32x1xi32>
    %c0_i32_2 = arith.constant 0 : i32
    %9 = vector.broadcast %c0_i32_2 : i32 to vector<32x1xi32>
    %10 = arith.cmpi slt, %6, %9 : vector<32x1xi32>
    %c0_i32_3 = arith.constant 0 : i32
    %11 = arith.cmpi slt, %4, %c0_i32_3 : i32
    %12 = vector.broadcast %11 : i1 to vector<32x1xi1>
    %13 = vector.broadcast %12 : vector<32x1xi1> to vector<32x1xi1>
    %14 = arith.xori %10, %13 : vector<32x1xi1>
    %15 = arith.andi %14, %8 : vector<32x1xi1>
    %16 = vector.broadcast %4 : i32 to vector<32x1xi32>
    %17 = arith.addi %6, %16 : vector<32x1xi32>
    %18 = arith.select %15, %17, %6 : vector<32x1xi1>, vector<32x1xi32>
    %c0_i32_4 = arith.constant 0 : i32
    %19 = vector.broadcast %c0_i32_4 : i32 to vector<32x1xi32>
    %20 = arith.cmpi eq, %18, %19 : vector<32x1xi32>
    %c15_i32 = arith.constant 15 : i32
    %21 = vector.broadcast %c15_i32 : i32 to vector<32x1xi32>
    %22 = arith.cmpi eq, %18, %21 : vector<32x1xi32>
    %c0_5 = arith.constant 0 : index
    %c0_6 = arith.constant 0 : index
    %23 = vector.load %arg2[%c0_5, %c0_6] : memref<12x8xbf16, #tpu.memory_space<vmem>>, vector<12x8xbf16>
    %c0_7 = arith.constant 0 : index
    %c0_8 = arith.constant 0 : index
    %24 = vector.load %arg3[%c0_7, %c0_8] : memref<1x8xf32, #tpu.memory_space<vmem>>, vector<1x8xf32>
    %c1_i32_9 = arith.constant 1 : i32
    %25 = tpu.dynamic_rotate %1 by %c1_i32_9 dim 0 : vector<32x4xf32>, i32 -> vector<32x4xf32>
    %cst = arith.constant 0.000000e+00 : f32
    %26 = vector.shape_cast %20 : vector<32x1xi1> to vector<32x1xi1>
    %27 = vector.broadcast %26 : vector<32x1xi1> to vector<32x4xi1>
    %28 = vector.broadcast %cst : f32 to vector<32x4xf32>
    %29 = arith.select %27, %28, %25 : vector<32x4xi1>, vector<32x4xf32>
    %c31_i32 = arith.constant 31 : i32
    %30 = tpu.dynamic_rotate %1 by %c31_i32 dim 0 : vector<32x4xf32>, i32 -> vector<32x4xf32>
    %cst_10 = arith.constant 0.000000e+00 : f32
    %31 = vector.shape_cast %22 : vector<32x1xi1> to vector<32x1xi1>
    %32 = vector.broadcast %31 : vector<32x1xi1> to vector<32x4xi1>
    %33 = vector.broadcast %cst_10 : f32 to vector<32x4xf32>
    %34 = arith.select %32, %33, %30 : vector<32x4xi1>, vector<32x4xf32>
    %35 = tpu.concatenate %29, %1, %34 in 1 : vector<32x4xf32>, vector<32x4xf32>, vector<32x4xf32> -> vector<32x12xf32>
    %36 = arith.truncf %35 : vector<32x12xf32> to vector<32x12xbf16>
    %cst_11 = arith.constant dense<0.000000e+00> : vector<32x8xf32>
    %37 = tpu.matmul %36, %23, %cst_11 {dimension_numbers = #tpu.dot_dimension_numbers<[1], [0], [0], [1], [0, 0, 1, 1], [], []>} : vector<32x12xbf16>, vector<12x8xbf16>, vector<32x8xf32> -> vector<32x8xf32>
    %38 = vector.broadcast %24 : vector<1x8xf32> to vector<32x8xf32>
    %39 = arith.addf %37, %38 : vector<32x8xf32>
    %cst_12 = arith.constant 0.000000e+00 : f32
    %40 = vector.broadcast %cst_12 : f32 to vector<32x8xf32>
    %41 = arith.cmpf ogt, %39, %40 : vector<32x8xf32>
    %cst_13 = arith.constant 2.000000e-01 : f32
    %42 = vector.broadcast %cst_13 : f32 to vector<32x8xf32>
    %43 = arith.mulf %42, %39 : vector<32x8xf32>
    %44 = arith.select %41, %39, %43 : vector<32x8xi1>, vector<32x8xf32>
    %c0_14 = arith.constant 0 : index
    %c0_15 = arith.constant 0 : index
    %45 = vector.load %arg4[%c0_14, %c0_15] : memref<24x8xbf16, #tpu.memory_space<vmem>>, vector<24x8xbf16>
    %c0_16 = arith.constant 0 : index
    %c0_17 = arith.constant 0 : index
    %46 = vector.load %arg5[%c0_16, %c0_17] : memref<1x8xf32, #tpu.memory_space<vmem>>, vector<1x8xf32>
    %c1_i32_18 = arith.constant 1 : i32
    %47 = tpu.dynamic_rotate %44 by %c1_i32_18 dim 0 : vector<32x8xf32>, i32 -> vector<32x8xf32>
    %cst_19 = arith.constant 0.000000e+00 : f32
    %48 = vector.shape_cast %20 : vector<32x1xi1> to vector<32x1xi1>
    %49 = vector.broadcast %48 : vector<32x1xi1> to vector<32x8xi1>
    %50 = vector.broadcast %cst_19 : f32 to vector<32x8xf32>
    %51 = arith.select %49, %50, %47 : vector<32x8xi1>, vector<32x8xf32>
    %c31_i32_20 = arith.constant 31 : i32
    %52 = tpu.dynamic_rotate %44 by %c31_i32_20 dim 0 : vector<32x8xf32>, i32 -> vector<32x8xf32>
    %cst_21 = arith.constant 0.000000e+00 : f32
    %53 = vector.shape_cast %22 : vector<32x1xi1> to vector<32x1xi1>
    %54 = vector.broadcast %53 : vector<32x1xi1> to vector<32x8xi1>
    %55 = vector.broadcast %cst_21 : f32 to vector<32x8xf32>
    %56 = arith.select %54, %55, %52 : vector<32x8xi1>, vector<32x8xf32>
    %57 = tpu.concatenate %51, %44, %56 in 1 : vector<32x8xf32>, vector<32x8xf32>, vector<32x8xf32> -> vector<32x24xf32>
    %58 = arith.truncf %57 : vector<32x24xf32> to vector<32x24xbf16>
    %cst_22 = arith.constant dense<0.000000e+00> : vector<32x8xf32>
    %59 = tpu.matmul %58, %45, %cst_22 {dimension_numbers = #tpu.dot_dimension_numbers<[1], [0], [0], [1], [0, 0, 1, 1], [], []>} : vector<32x24xbf16>, vector<24x8xbf16>, vector<32x8xf32> -> vector<32x8xf32>
    %60 = vector.broadcast %46 : vector<1x8xf32> to vector<32x8xf32>
    %61 = arith.addf %59, %60 : vector<32x8xf32>
    %cst_23 = arith.constant 0.000000e+00 : f32
    %62 = vector.broadcast %cst_23 : f32 to vector<32x8xf32>
    %63 = arith.cmpf ogt, %61, %62 : vector<32x8xf32>
    %cst_24 = arith.constant 2.000000e-01 : f32
    %64 = vector.broadcast %cst_24 : f32 to vector<32x8xf32>
    %65 = arith.mulf %64, %61 : vector<32x8xf32>
    %66 = arith.select %63, %61, %65 : vector<32x8xi1>, vector<32x8xf32>
    %c0_25 = arith.constant 0 : index
    %c0_26 = arith.constant 0 : index
    %67 = vector.load %arg16[%c0_25, %c0_26] : memref<32x8xf32, #tpu.memory_space<vmem>>, vector<32x8xf32>
    tpu.vector_store %arg16[%c0_25, %c0_26], %66 {strides = array<i32>} : memref<32x8xf32, #tpu.memory_space<vmem>>, vector<32x8xf32>,
    %c0_27 = arith.constant 0 : index
    %c0_28 = arith.constant 0 : index
    %68 = tpu.strided_load %arg16[%c0_27, %c0_28] {strides = array<i32: 2, 1>} : memref<32x8xf32, #tpu.memory_space<vmem>>, vector<16x8xf32>
    %c1 = arith.constant 1 : index
    %c0_29 = arith.constant 0 : index
    %69 = tpu.strided_load %arg16[%c1, %c0_29] {strides = array<i32: 2, 1>} : memref<32x8xf32, #tpu.memory_space<vmem>>, vector<16x8xf32>
    %70 = arith.addf %68, %69 : vector<16x8xf32>
    %c0_30 = arith.constant 0 : index
    %c0_31 = arith.constant 0 : index
    %71 = vector.load %arg6[%c0_30, %c0_31] : memref<8x8xbf16, #tpu.memory_space<vmem>>, vector<8x8xbf16>
    %72 = arith.truncf %70 : vector<16x8xf32> to vector<16x8xbf16>
    %cst_32 = arith.constant dense<0.000000e+00> : vector<8x16xf32>
    %73 = tpu.matmul %71, %72, %cst_32 {dimension_numbers = #tpu.dot_dimension_numbers<[1], [1], [0], [0], [0, 0, 1, 0], [], []>} : vector<8x8xbf16>, vector<16x8xbf16>, vector<8x16xf32> -> vector<8x16xf32>
    %c0_33 = arith.constant 0 : index
    %c0_34 = arith.constant 0 : index
    %74 = vector.load %arg7[%c0_33, %c0_34] : memref<8x1xf32, #tpu.memory_space<vmem>>, vector<8x1xf32>
    %75 = vector.broadcast %74 : vector<8x1xf32> to vector<8x16xf32>
    %76 = arith.addf %73, %75 : vector<8x16xf32>
    %c0_35 = arith.constant 0 : index
    %c0_36 = arith.constant 0 : index
    %c0_37 = arith.constant 0 : index
    %77 = vector.load %arg14[%c0_35, %c0_36, %c0_37] : memref<1x8x16xf32, #tpu.memory_space<vmem>>, vector<1x8x16xf32>
    %78 = vector.shape_cast %77 : vector<1x8x16xf32> to vector<8x16xf32>
    %79 = vector.shape_cast %76 : vector<8x16xf32> to vector<1x8x16xf32>
    tpu.vector_store %arg14[%c0_35, %c0_36, %c0_37], %79 {strides = array<i32>} : memref<1x8x16xf32, #tpu.memory_space<vmem>>, vector<1x8x16xf32>,
    %80 = tpu.iota {dimensions = array<i32: 0>} : vector<16x1xi32>
    %c8_i32 = arith.constant 8 : i32
    %c0_i32_38 = arith.constant 0 : i32
    %81 = arith.cmpi eq, %c8_i32, %c0_i32_38 : i32
    %c1_i32_39 = arith.constant 1 : i32
    %82 = arith.select %81, %c1_i32_39, %c8_i32 : i32
    %83 = vector.broadcast %82 : i32 to vector<16x1xi32>
    %84 = arith.remsi %80, %83 : vector<16x1xi32>
    %c0_i32_40 = arith.constant 0 : i32
    %85 = vector.broadcast %c0_i32_40 : i32 to vector<16x1xi32>
    %86 = arith.cmpi ne, %84, %85 : vector<16x1xi32>
    %c0_i32_41 = arith.constant 0 : i32
    %87 = vector.broadcast %c0_i32_41 : i32 to vector<16x1xi32>
    %88 = arith.cmpi slt, %84, %87 : vector<16x1xi32>
    %c0_i32_42 = arith.constant 0 : i32
    %89 = arith.cmpi slt, %82, %c0_i32_42 : i32
    %90 = vector.broadcast %89 : i1 to vector<16x1xi1>
    %91 = vector.broadcast %90 : vector<16x1xi1> to vector<16x1xi1>
    %92 = arith.xori %88, %91 : vector<16x1xi1>
    %93 = arith.andi %92, %86 : vector<16x1xi1>
    %94 = vector.broadcast %82 : i32 to vector<16x1xi32>
    %95 = arith.addi %84, %94 : vector<16x1xi32>
    %96 = arith.select %93, %95, %84 : vector<16x1xi1>, vector<16x1xi32>
    %c0_i32_43 = arith.constant 0 : i32
    %97 = vector.broadcast %c0_i32_43 : i32 to vector<16x1xi32>
    %98 = arith.cmpi eq, %96, %97 : vector<16x1xi32>
    %c7_i32 = arith.constant 7 : i32
    %99 = vector.broadcast %c7_i32 : i32 to vector<16x1xi32>
    %100 = arith.cmpi eq, %96, %99 : vector<16x1xi32>
    %c0_44 = arith.constant 0 : index
    %c0_45 = arith.constant 0 : index
    %101 = vector.load %arg8[%c0_44, %c0_45] : memref<24x16xbf16, #tpu.memory_space<vmem>>, vector<24x16xbf16>
    %c0_46 = arith.constant 0 : index
    %c0_47 = arith.constant 0 : index
    %102 = vector.load %arg9[%c0_46, %c0_47] : memref<1x16xf32, #tpu.memory_space<vmem>>, vector<1x16xf32>
    %c1_i32_48 = arith.constant 1 : i32
    %103 = tpu.dynamic_rotate %70 by %c1_i32_48 dim 0 : vector<16x8xf32>, i32 -> vector<16x8xf32>
    %cst_49 = arith.constant 0.000000e+00 : f32
    %104 = vector.shape_cast %98 : vector<16x1xi1> to vector<16x1xi1>
    %105 = vector.broadcast %104 : vector<16x1xi1> to vector<16x8xi1>
    %106 = vector.broadcast %cst_49 : f32 to vector<16x8xf32>
    %107 = arith.select %105, %106, %103 : vector<16x8xi1>, vector<16x8xf32>
    %c15_i32_50 = arith.constant 15 : i32
    %108 = tpu.dynamic_rotate %70 by %c15_i32_50 dim 0 : vector<16x8xf32>, i32 -> vector<16x8xf32>
    %cst_51 = arith.constant 0.000000e+00 : f32
    %109 = vector.shape_cast %100 : vector<16x1xi1> to vector<16x1xi1>
    %110 = vector.broadcast %109 : vector<16x1xi1> to vector<16x8xi1>
    %111 = vector.broadcast %cst_51 : f32 to vector<16x8xf32>
    %112 = arith.select %110, %111, %108 : vector<16x8xi1>, vector<16x8xf32>
    %113 = tpu.concatenate %107, %70, %112 in 1 : vector<16x8xf32>, vector<16x8xf32>, vector<16x8xf32> -> vector<16x24xf32>
    %114 = arith.truncf %113 : vector<16x24xf32> to vector<16x24xbf16>
    %cst_52 = arith.constant dense<0.000000e+00> : vector<16x16xf32>
    %115 = tpu.matmul %114, %101, %cst_52 {dimension_numbers = #tpu.dot_dimension_numbers<[1], [0], [0], [1], [0, 0, 1, 1], [], []>} : vector<16x24xbf16>, vector<24x16xbf16>, vector<16x16xf32> -> vector<16x16xf32>
    %116 = vector.broadcast %102 : vector<1x16xf32> to vector<16x16xf32>
    %117 = arith.addf %115, %116 : vector<16x16xf32>
    %cst_53 = arith.constant 0.000000e+00 : f32
    %118 = vector.broadcast %cst_53 : f32 to vector<16x16xf32>
    %119 = arith.cmpf ogt, %117, %118 : vector<16x16xf32>
    %cst_54 = arith.constant 2.000000e-01 : f32
    %120 = vector.broadcast %cst_54 : f32 to vector<16x16xf32>
    %121 = arith.mulf %120, %117 : vector<16x16xf32>
    %122 = arith.select %119, %117, %121 : vector<16x16xi1>, vector<16x16xf32>
    %c0_55 = arith.constant 0 : index
    %c0_56 = arith.constant 0 : index
    %123 = vector.load %arg10[%c0_55, %c0_56] : memref<48x16xbf16, #tpu.memory_space<vmem>>, vector<48x16xbf16>
    %c0_57 = arith.constant 0 : index
    %c0_58 = arith.constant 0 : index
    %124 = vector.load %arg11[%c0_57, %c0_58] : memref<1x16xf32, #tpu.memory_space<vmem>>, vector<1x16xf32>
    %c1_i32_59 = arith.constant 1 : i32
    %125 = tpu.dynamic_rotate %122 by %c1_i32_59 dim 0 : vector<16x16xf32>, i32 -> vector<16x16xf32>
    %cst_60 = arith.constant 0.000000e+00 : f32
    %126 = vector.shape_cast %98 : vector<16x1xi1> to vector<16x1xi1>
    %127 = vector.broadcast %126 : vector<16x1xi1> to vector<16x16xi1>
    %128 = vector.broadcast %cst_60 : f32 to vector<16x16xf32>
    %129 = arith.select %127, %128, %125 : vector<16x16xi1>, vector<16x16xf32>
    %c15_i32_61 = arith.constant 15 : i32
    %130 = tpu.dynamic_rotate %122 by %c15_i32_61 dim 0 : vector<16x16xf32>, i32 -> vector<16x16xf32>
    %cst_62 = arith.constant 0.000000e+00 : f32
    %131 = vector.shape_cast %100 : vector<16x1xi1> to vector<16x1xi1>
    %132 = vector.broadcast %131 : vector<16x1xi1> to vector<16x16xi1>
    %133 = vector.broadcast %cst_62 : f32 to vector<16x16xf32>
    %134 = arith.select %132, %133, %130 : vector<16x16xi1>, vector<16x16xf32>
    %135 = tpu.concatenate %129, %122, %134 in 1 : vector<16x16xf32>, vector<16x16xf32>, vector<16x16xf32> -> vector<16x48xf32>
    %136 = arith.truncf %135 : vector<16x48xf32> to vector<16x48xbf16>
    %cst_63 = arith.constant dense<0.000000e+00> : vector<16x16xf32>
    %137 = tpu.matmul %136, %123, %cst_63 {dimension_numbers = #tpu.dot_dimension_numbers<[1], [0], [0], [1], [0, 0, 1, 1], [], []>} : vector<16x48xbf16>, vector<48x16xbf16>, vector<16x16xf32> -> vector<16x16xf32>
    %138 = vector.broadcast %124 : vector<1x16xf32> to vector<16x16xf32>
    %139 = arith.addf %137, %138 : vector<16x16xf32>
    %cst_64 = arith.constant 0.000000e+00 : f32
    %140 = vector.broadcast %cst_64 : f32 to vector<16x16xf32>
    %141 = arith.cmpf ogt, %139, %140 : vector<16x16xf32>
    %cst_65 = arith.constant 2.000000e-01 : f32
    %142 = vector.broadcast %cst_65 : f32 to vector<16x16xf32>
    %143 = arith.mulf %142, %139 : vector<16x16xf32>
    %144 = arith.select %141, %139, %143 : vector<16x16xi1>, vector<16x16xf32>
    %c0_66 = arith.constant 0 : index
    %c0_67 = arith.constant 0 : index
    %145 = vector.load %arg17[%c0_66, %c0_67] : memref<16x16xf32, #tpu.memory_space<vmem>>, vector<16x16xf32>
    tpu.vector_store %arg17[%c0_66, %c0_67], %144 {strides = array<i32>} : memref<16x16xf32, #tpu.memory_space<vmem>>, vector<16x16xf32>,
    %c0_68 = arith.constant 0 : index
    %c0_69 = arith.constant 0 : index
    %146 = tpu.strided_load %arg17[%c0_68, %c0_69] {strides = array<i32: 2, 1>} : memref<16x16xf32, #tpu.memory_space<vmem>>, vector<8x16xf32>
    %c1_70 = arith.constant 1 : index
    %c0_71 = arith.constant 0 : index
    %147 = tpu.strided_load %arg17[%c1_70, %c0_71] {strides = array<i32: 2, 1>} : memref<16x16xf32, #tpu.memory_space<vmem>>, vector<8x16xf32>
    %148 = arith.addf %146, %147 : vector<8x16xf32>
    %c0_72 = arith.constant 0 : index
    %c0_73 = arith.constant 0 : index
    %149 = vector.load %arg12[%c0_72, %c0_73] : memref<8x16xbf16, #tpu.memory_space<vmem>>, vector<8x16xbf16>
    %150 = arith.truncf %148 : vector<8x16xf32> to vector<8x16xbf16>
    %cst_74 = arith.constant dense<0.000000e+00> : vector<8x8xf32>
    %151 = tpu.matmul %149, %150, %cst_74 {dimension_numbers = #tpu.dot_dimension_numbers<[1], [1], [0], [0], [0, 0, 1, 0], [], []>} : vector<8x16xbf16>, vector<8x16xbf16>, vector<8x8xf32> -> vector<8x8xf32>
    %c0_75 = arith.constant 0 : index
    %c0_76 = arith.constant 0 : index
    %152 = vector.load %arg13[%c0_75, %c0_76] : memref<8x1xf32, #tpu.memory_space<vmem>>, vector<8x1xf32>
    %153 = vector.broadcast %152 : vector<8x1xf32> to vector<8x8xf32>
    %154 = arith.addf %151, %153 : vector<8x8xf32>
    %c0_77 = arith.constant 0 : index
    %c0_78 = arith.constant 0 : index
    %c0_79 = arith.constant 0 : index
    %155 = vector.load %arg15[%c0_77, %c0_78, %c0_79] : memref<1x8x8xf32, #tpu.memory_space<vmem>>, vector<1x8x8xf32>
    %156 = vector.shape_cast %155 : vector<1x8x8xf32> to vector<8x8xf32>
    %157 = vector.shape_cast %154 : vector<8x8xf32> to vector<1x8x8xf32>
    tpu.vector_store %arg15[%c0_77, %c0_78, %c0_79], %157 {strides = array<i32>} : memref<1x8x8xf32, #tpu.memory_space<vmem>>, vector<1x8x8xf32>,
    return
  }
  func.func @transform_0(%arg0: i32) -> (i32, i32) {
    %c0_i32 = arith.constant 0 : i32
    %c0_i32_0 = arith.constant 0 : i32
    return %arg0, %c0_i32 : i32, i32
  }
  func.func @transform_1(%arg0: i32) -> (i32, i32) {
    %c0_i32 = arith.constant 0 : i32
    %c0_i32_0 = arith.constant 0 : i32
    %c0_i32_1 = arith.constant 0 : i32
    return %c0_i32, %c0_i32_0 : i32, i32
  }
  func.func @transform_2(%arg0: i32) -> (i32, i32) {
    %c0_i32 = arith.constant 0 : i32
    %c0_i32_0 = arith.constant 0 : i32
    %c0_i32_1 = arith.constant 0 : i32
    return %c0_i32, %c0_i32_0 : i32, i32
  }
  func.func @transform_3(%arg0: i32) -> (i32, i32) {
    %c0_i32 = arith.constant 0 : i32
    %c0_i32_0 = arith.constant 0 : i32
    %c0_i32_1 = arith.constant 0 : i32
    return %c0_i32, %c0_i32_0 : i32, i32
  }
  func.func @transform_4(%arg0: i32) -> (i32, i32) {
    %c0_i32 = arith.constant 0 : i32
    %c0_i32_0 = arith.constant 0 : i32
    %c0_i32_1 = arith.constant 0 : i32
    return %c0_i32, %c0_i32_0 : i32, i32
  }
  func.func @transform_5(%arg0: i32) -> (i32, i32) {
    %c0_i32 = arith.constant 0 : i32
    %c0_i32_0 = arith.constant 0 : i32
    %c0_i32_1 = arith.constant 0 : i32
    return %c0_i32, %c0_i32_0 : i32, i32
  }
  func.func @transform_6(%arg0: i32) -> (i32, i32) {
    %c0_i32 = arith.constant 0 : i32
    %c0_i32_0 = arith.constant 0 : i32
    %c0_i32_1 = arith.constant 0 : i32
    return %c0_i32, %c0_i32_0 : i32, i32
  }
  func.func @transform_7(%arg0: i32) -> (i32, i32) {
    %c0_i32 = arith.constant 0 : i32
    %c0_i32_0 = arith.constant 0 : i32
    %c0_i32_1 = arith.constant 0 : i32
    return %c0_i32, %c0_i32_0 : i32, i32
  }
  func.func @transform_8(%arg0: i32) -> (i32, i32) {
    %c0_i32 = arith.constant 0 : i32
    %c0_i32_0 = arith.constant 0 : i32
    %c0_i32_1 = arith.constant 0 : i32
    return %c0_i32, %c0_i32_0 : i32, i32
  }
  func.func @transform_9(%arg0: i32) -> (i32, i32) {
    %c0_i32 = arith.constant 0 : i32
    %c0_i32_0 = arith.constant 0 : i32
    %c0_i32_1 = arith.constant 0 : i32
    return %c0_i32, %c0_i32_0 : i32, i32
  }
  func.func @transform_10(%arg0: i32) -> (i32, i32) {
    %c0_i32 = arith.constant 0 : i32
    %c0_i32_0 = arith.constant 0 : i32
    %c0_i32_1 = arith.constant 0 : i32
    return %c0_i32, %c0_i32_0 : i32, i32
  }
  func.func @transform_11(%arg0: i32) -> (i32, i32) {
    %c0_i32 = arith.constant 0 : i32
    %c0_i32_0 = arith.constant 0 : i32
    %c0_i32_1 = arith.constant 0 : i32
    return %c0_i32, %c0_i32_0 : i32, i32
  }
  func.func @transform_12(%arg0: i32) -> (i32, i32) {
    %c0_i32 = arith.constant 0 : i32
    %c0_i32_0 = arith.constant 0 : i32
    %c0_i32_1 = arith.constant 0 : i32
    return %c0_i32, %c0_i32_0 : i32, i32
  }
  func.func @transform_13(%arg0: i32) -> (i32, i32, i32) {
    %c0_i32 = arith.constant 0 : i32
    %c0_i32_0 = arith.constant 0 : i32
    %c0_i32_1 = arith.constant 0 : i32
    return %arg0, %c0_i32, %c0_i32_0 : i32, i32, i32
  }
  func.func @transform_14(%arg0: i32) -> (i32, i32, i32) {
    %c0_i32 = arith.constant 0 : i32
    %c0_i32_0 = arith.constant 0 : i32
    %c0_i32_1 = arith.constant 0 : i32
    return %arg0, %c0_i32, %c0_i32_0 : i32, i32, i32
  }
}

</mosaic_0001>

<bundles_post_ra>
// kernel: transform_network_forward.1
= control target key start
LH: loop header
LB: loop body
LE: loop exit
PB: predicated region body
PF: predicated region fallthrough
CT: control target
= control target key end

     0   :  { %s1628_s29 = smov 0   ;;  %s1899_s0 = inlined_call_operand.vmem [shape: bf16[64,4], index: 0, kind: input, shape index: {}]   ;;  %s1900_s1 = inlined_call_operand.vmem [shape: bf16[12,8], index: 1, kind: input, shape index: {}]   ;;  %s1901_s2 = inlined_call_operand.vmem [shape: f32[1,8], index: 2, kind: input, shape index: {}]   ;;  %s1902_s3 = inlined_call_operand.vmem [shape: bf16[24,8], index: 3, kind: input, shape index: {}]   ;;  %s1903_s4 = inlined_call_operand.vmem [shape: f32[1,8], index: 4, kind: input, shape index: {}]   ;;  %s1904_s5 = inlined_call_operand.vmem [shape: bf16[8,8], index: 5, kind: input, shape index: {}]   ;;  %s1905_s6 = inlined_call_operand.vmem [shape: f32[8,1], index: 6, kind: input, shape index: {}]   ;;  %s1906_s7 = inlined_call_operand.vmem [shape: bf16[24,16], index: 7, kind: input, shape index: {}]   ;;  %s1907_s8 = inlined_call_operand.vmem [shape: f32[1,16], index: 8, kind: input, shape index: {}]   ;;  %s1908_s9 = inlined_call_operand.vmem [shape: bf16[48,16], index: 9, kind: input, shape index: {}]   ;;  %s1909_s10 = inlined_call_operand.vmem [shape: f32[1,16], index: 10, kind: input, shape index: {}]   ;;  %s1910_s11 = inlined_call_operand.vmem [shape: bf16[8,16], index: 11, kind: input, shape index: {}]   ;;  %s1911_s12 = inlined_call_operand.vmem [shape: f32[8,1], index: 12, kind: input, shape index: {}]   ;;  %s1912_s13 = inlined_call_operand.vmem [shape: f32[2,8,16], index: 13, kind: output, shape index: {0}]   ;;  %s1913_s14 = inlined_call_operand.vmem [shape: f32[2,8,8], index: 14, kind: output, shape index: {1}]  }
   0x1 LB: > { %s1634_s30 = sadd.s32 4294967295, %s1544_s29   ;;  %p1353_p0 = scmp.ge.s32.totalorder %s1544_s29, 1  ;;  %s1544_s29 = sphi %s1628_s29, %s25_s29  }
   0x2   : > { %p416_p1 = scmp.lt.s32.totalorder %s1544_s29, 3 }
   0x4   : > { %p417_p2 = pnand %p1353_p0, %p416_p1 }
   0x5   : > { %s1354_s15 = sshll.u32 (!%p417_p2), %s1634_s30, 2  ;;  %s1546_s22 = smov (!%p417_p2), 4  }
   0x6   : > { %420 = sbr.rel (%p417_p2) target bundleno = 1568 (0x620), region = 72  ;;  %p466_p3 = scmp.lt.s32.totalorder (!%p417_p2), %s1354_s15, 7 }
   0x7   : > { %s1547_s23 = smov (!%p417_p2), 8   ;;  %s1552_s21 = smov (!%p417_p2), 32  }
   0x8   : > { %p471_p4 = scmp.lt.s32.totalorder (!%p417_p2), %s1634_s30, 1 }
   0xb   : > { %v488_v0 = vlaneseq  ;;  %s1931_s15 = smov (!%p466_p3, %s1354_s15), 7  ;;  %v1530_v8 = vld [vmem:[%s1900_s1] sm:$0x3f]   ;;  %vm656_vm3 = vcmask 1045504   ;;  %vm626_vm6 = vcmask 31744   ;;  %vm631_vm8 = vcmask 64512  }
   0xc   : > { %s1355_s16 = sshll.u32 %s1931_s15, 2  ;;  %1451 = vmatprep.subr.msk.bf16.mxu0 %vm656_vm3, %v1530_v8  ;;  %v658_v36 = vsel %vm656_vm3, %v1530_v8, 0  ;;  %vm649_vm9 = vcmask 97280   ;;  %vm814_vm10 = vcmask 1043456   ;;  %vm785_vm15 = vcmask 130048   ;;  %s1933_s30 = smov (!%p471_p4, %s1634_s30), 1 }
   0xd   : > { %v1639_v1 = vshrl.u32 %v488_v0, 7  ;;  %s469_s19 = scalar_lea.vmem %s1899_s0, %s1355_s16  ;;  %1408 = vmatpush3.bf16.msra.mxu0 %v658_v36  ;;  %s1548_s16 = smov 16  }
   0xe   : > { %v1381_v5 = vld [vmem:[%s469_s19] sm:$0xff]   ;;  %v1388_v6 = vld [vmem:[%s469_s19 + $0x8] sm:$0xff]  }
   0xf   : > { %v1642_v2 = vadd.s32 8, %v1639_v1  ;;  %v492_v3 = vadd.s32 24, %v1639_v1  ;;  %v1382_v9 = vunpack.c.l.bf16 %v1381_v5  ;;  %v1383_v10 = vunpack.c.h.bf16 %v1381_v5  ;;  %v1358_v5 = vld [vmem:[%s1901_s2] ss:$0 sm:$0xff] }
  0x10   : > { %v1386_v11 = vunpack.c.l.bf16 %v1388_v6  ;;  %vm577_vm0 = vcmp.lt.s32.totalorder %v1639_v1, 7  ;;  %v1387_v13 = vunpack.c.h.bf16 %v1388_v6  ;;  %vm556_vm2 = vcmp.lt.s32.totalorder %v1639_v1, 1 }
  0x11   : > { %v504_v4 = vand.u32 15, %v1642_v2  ;;  %v518_v7 = vand.u32 15, %v492_v3  ;;  %v553_v14 = vrot.slane %v1383_v10, 7  ;;  %v1468_v15 = vpack.i.bf16 %v1383_v10, %v1382_v9 }
  0x12   : > { %v552_v16 = vrot.slane %v1382_v9, 7  ;;  %v573_v17 = vrot.slane %v1382_v9, 1  ;;  %v574_v18 = vrot.slane %v1383_v10, 1  ;;  %v575_v19 = vrot.slane %v1386_v11, 1  ;;  %v1531_v9 = vld [vmem:[%s1902_s3 + $0x8] ss:$0 sps:$4 sm:$0xff]  }
  0x13   : > { %vm1653_vm1 = vcmp.eq.s32.totalorder %v504_v4, 15  ;;  %vm1659_vm4 = vcmp.eq.s32.totalorder %v518_v7, 15  ;;  %v576_v21 = vrot.slane %v1387_v13, 1  ;;  %1469 = vrot.lane.b32.xlu0 %v1468_v15, %s1546_s22  ;;  %v1473_v22 = vpack.i.bf16 %v1387_v13, %v1386_v11  ;;  %1452 = vmatprep.subr.msk.bf16.mxu1 %vm814_vm10, %v1531_v9 }
  0x14   : > { %v554_v23 = vrot.slane %v1386_v11, 7  ;;  %v555_v24 = vrot.slane %v1387_v13, 7  ;;  %v559_v25 = vsel %vm556_vm2, %v552_v16, %v553_v14  ;;  %v579_v26 = vsel %vm577_vm0, %v574_v18, %v575_v19 }
  0x15   : > { %v580_v27 = vsel %vm577_vm0, %v573_v17, %v574_v18  ;;  %v578_v28 = vsel %vm577_vm0, %v575_v19, %v576_v21  ;;  %v581_v29 = vsel %vm577_vm0, %v576_v21, %v573_v17  ;;  %v591_v30 = vsel %vm1653_vm1, 0.0, %v579_v26  ;;  %v1532_v18 = vld [vmem:[%s1902_s3] sm:$0xff]  }
  0x16   : > { %v593_v31 = vsel %vm1659_vm4, 0.0, %v581_v29  ;;  %v557_v32 = vsel %vm556_vm2, %v554_v23, %v555_v24  ;;  %v558_v33 = vsel %vm556_vm2, %v553_v14, %v554_v23  ;;  %v1478_v34 = vpack.i.bf16 %v591_v30, %v580_v27 }
  0x17   : > { %v560_v35 = vsel %vm556_vm2, %v555_v24, %v552_v16  ;;  %1474 = vrot.lane.b32.xlu0 %v1473_v22, %s1546_s22  ;;  %v1483_v37 = vpack.i.bf16 %v593_v31, %v578_v28  ;;  %v491_v38 = vadd.s32 16, %v1639_v1  ;;  %v497_v39 = vand.u32 15, %v1639_v1  ;;  %s1356_s22 = sshll.u32 %s1933_s30, 3 }
  0x18   : > { %1479 = vrot.lane.b32.xlu1 %v1478_v34, %s1547_s23  ;;  %v816_v14 = vsel %vm814_vm10, %v1531_v9, 0  ;;  %v1549_v9 = vmov 0.0   ;;  %s474_s25 = scalar_lea.vmem %s1912_s13, %s1356_s22  ;;  %s478_s20 = scalar_lea.vmem %s1913_s14, %s1356_s22 }
  0x19   : > { %v511_v40 = vand.u32 15, %v491_v38  ;;  %vm1688_vm5 = vcmp.eq.s32.totalorder %v497_v39, 0  ;;  %1414 = vmatpush3.bf16.msra.mxu1 %v816_v14  ;;  %1421 = vmatprep.subr.bf16.mxu0 %v1549_v9 }
  0x1a   : > { %v569_v45 = vsel %vm1688_vm5, 0.0, %v560_v35  ;;  %1415 = vmatprep.subr.bf16.mxu1 %v1532_v18 }
  0x1b   : > { %vm1694_vm7 = vcmp.eq.s32.totalorder %v511_v40, 0 }
  0x1c   : > { %1484 = vrot.lane.b32.xlu1 %v1483_v37, %s1547_s23  ;;  %v571_v55 = vsel %vm1694_vm7, 0.0, %v558_v33 }
  0x1d   : > { %1416 = vmatpush3.bf16.msra.mxu1 %v1532_v18 }
  0x1e   : > { %1427 = vmatprep.subr.bf16.mxu1 %v1549_v9 }
  0x85   : > { %v1470_v42 = vpop.permute.xlu0 %1469 }
  0x86   : > { %v1472_v43 = vunpack.i.h.bf16 %v1470_v42  ;;  %v1471_v44 = vunpack.i.l.bf16 %v1470_v42 }
  0x88   : > { %v627_v51 = vsel %vm626_vm6, %v569_v45, %v1471_v44  ;;  %v628_v52 = vsel %vm626_vm6, %v559_v25, %v1472_v43 }
  0x89   : > { %v1475_v47 = vpop.permute.xlu0 %1474 }
  0x8a   : > { %v1480_v48 = vpop.permute.xlu1 %1479  ;;  %v1477_v49 = vunpack.i.h.bf16 %v1475_v47  ;;  %v1476_v50 = vunpack.i.l.bf16 %v1475_v47 }
  0x8b   : > { %v1482_v53 = vunpack.i.h.bf16 %v1480_v48  ;;  %v1481_v54 = vunpack.i.l.bf16 %v1480_v48 }
  0x8c   : > { %v630_v58 = vsel %vm626_vm6, %v557_v32, %v1477_v49  ;;  %v629_v59 = vsel %vm626_vm6, %v571_v55, %v1476_v50 }
  0x8d   : > { %v632_v56 = vsel %vm631_vm8, %v627_v51, %v1481_v54  ;;  %v633_v57 = vsel %vm631_vm8, %v628_v52, %v1482_v53 }
  0x8e   : > { %v1485_v60 = vpop.permute.xlu1 %1484  ;;  %v636_v61 = vpack.c.bf16 %v633_v57, %v632_v56 }
  0x8f   : > { %v1487_v62 = vunpack.i.h.bf16 %v1485_v60  ;;  %v1486_v63 = vunpack.i.l.bf16 %v1485_v60 }
  0x90   : > { %1409 = vmatprep.mubr.msk.bf16.mxu0 %vm649_vm9, %v636_v61 }
  0x91   : > { %v635_v0 = vsel %vm631_vm8, %v630_v58, %v1487_v62  ;;  %v634_v3 = vsel %vm631_vm8, %v629_v59, %v1486_v63 }
  0x92   : > { %v637_v4 = vpack.c.bf16 %v635_v0, %v634_v3 }
  0x94   : > { %1410 = vmatmul.mubr.msk.bf16.vlgmr.msra.gmra.mxu0 %vm649_vm9, %v637_v4 }
 0x154   : > { %v1411_v6 = vpop.f32.mrf.mxu0 }
 0x155   : > { %v703_v7 = vadd.f32 %v1411_v6, %v1358_v5 }
 0x156   : > { %v694_v8 = vpop.f32.mrf.mxu0 }
 0x157   : > { %v715_v10 = vmul.f32 0.2, %v703_v7  ;;  %v695_v11 = vadd.f32 %v1358_v5, %v694_v8  ;;  %vm711_vm11 = vcmp.gt.f32.partialorder %v703_v7, 0.0 }
 0x158   : > { %v1412_v13 = vpop.f32.mrf.mxu0 }
 0x159   : > { %vm709_vm12 = vcmp.gt.f32.partialorder %v695_v11, 0.0  ;;  %v713_v15 = vmul.f32 0.2, %v695_v11  ;;  %v706_v16 = vadd.f32 %v1412_v13, %v1358_v5  ;;  %v719_v19 = vsel %vm711_vm11, %v703_v7, %v715_v10  ;;  %v1362_v10 = vld [vmem:[%s1903_s4] ss:$0 sm:$0xff] }
 0x15a   : > { %v697_v17 = vpop.f32.mrf.mxu0  ;;  %v739_v26 = vrot.slane %v719_v19, 1  ;;  %v727_v30 = vrot.slane %v719_v19, 7 }
 0x15b   : > { %vm712_vm13 = vcmp.gt.f32.partialorder %v706_v16, 0.0  ;;  %v716_v21 = vmul.f32 0.2, %v706_v16  ;;  %v698_v22 = vadd.f32 %v1358_v5, %v697_v17  ;;  %v717_v23 = vsel %vm709_vm12, %v695_v11, %v713_v15 }
 0x15c   : > { %v725_v31 = vrot.slane %v717_v23, 7  ;;  %v737_v32 = vrot.slane %v717_v23, 1 }
 0x15d   : > { %v720_v24 = vsel %vm712_vm13, %v706_v16, %v716_v21  ;;  %vm710_vm14 = vcmp.gt.f32.partialorder %v698_v22, 0.0  ;;  %v714_v25 = vmul.f32 0.2, %v698_v22 }
 0x15e   : > { %v728_v27 = vrot.slane %v720_v24, 7  ;;  %v740_v28 = vrot.slane %v720_v24, 1  ;;  %v1488_v29 = vpack.i.bf16 %v720_v24, %v719_v19 }
 0x15f   : > { %v718_v33 = vsel %vm710_vm14, %v698_v22, %v714_v25 }
 0x160   : > { %v726_v34 = vrot.slane %v718_v33, 7  ;;  %v738_v35 = vrot.slane %v718_v33, 1  ;;  %1489 = vrot.lane.b32.xlu1 %v1488_v29, %s1547_s23  ;;  %v1493_v36 = vpack.i.bf16 %v718_v33, %v717_v23  ;;  %v741_v37 = vsel %vm577_vm0, %v739_v26, %v740_v28  ;;  %v1533_v29 = vld [vmem:[%s1906_s7 + $0x8] ss:$0 sps:$4 sm:$0xff]  }
 0x161   : > { %v744_v38 = vsel %vm577_vm0, %v740_v28, %v737_v32  ;;  %v729_v39 = vsel %vm556_vm2, %v727_v30, %v728_v27  ;;  %v732_v40 = vsel %vm556_vm2, %v728_v27, %v725_v31  ;;  %v951_v33 = vand.u32 7, %v1639_v1 }
 0x162   : > { %1494 = vrot.lane.b32.xlu0 %v1493_v36, %s1547_s23  ;;  %v748_v42 = vsel %vm1659_vm4, 0.0, %v744_v38  ;;  %v742_v43 = vsel %vm577_vm0, %v738_v35, %v739_v26  ;;  %v743_v44 = vsel %vm577_vm0, %v737_v32, %v738_v35  ;;  %v730_v45 = vsel %vm556_vm2, %v726_v34, %v727_v30  ;;  %v1534_v36 = vld [vmem:[%s1906_s7] sm:$0xff]  }
 0x163   : > { %v1503_v47 = vpack.i.bf16 %v748_v42, %v741_v37  ;;  %v746_v48 = vsel %vm1653_vm1, 0.0, %v742_v43  ;;  %v731_v49 = vsel %vm556_vm2, %v725_v31, %v726_v34  ;;  %v735_v12 = vsel %vm1694_vm7, 0.0, %v730_v45 }
 0x164   : > { %v1498_v50 = vpack.i.bf16 %v746_v48, %v743_v44  ;;  %v733_v60 = vsel %vm1688_vm5, 0.0, %v732_v40  ;;  %vm807_vm1 = vcmask 195584   ;;  %v1039_v30 = vsel %vm814_vm10, %v1533_v29, 0 }
 0x165   : > { %1504 = vrot.lane.b32.xlu1 %v1503_v47, %s1548_s16  ;;  %v958_v34 = vand.u32 7, %v1642_v2  ;;  %vm1550_vm7 = vmmov 0   ;;  %vm1780_vm9 = vcmp.eq.s32.totalorder %v951_v33, 7  ;;  %vm1805_vm11 = vcmp.eq.s32.totalorder %v951_v33, 0 }
 0x166   : > { %1499 = vrot.lane.b32.xlu0 %v1498_v50, %s1548_s16  ;;  %1423 = vmatprep.mubr.msk.bf16.mxu0 %vm1550_vm7, %v1549_v9 }
 0x167   : > { %vm1784_vm10 = vcmp.eq.s32.totalorder %v958_v34, 7  ;;  %vm1809_vm12 = vcmp.eq.s32.totalorder %v958_v34, 0 }
 0x1d2   : > { %v1490_v20 = vpop.permute.xlu1 %1489 }
 0x1d3   : > { %v1492_v52 = vunpack.i.h.bf16 %v1490_v20  ;;  %v1491_v53 = vunpack.i.l.bf16 %v1490_v20 }
 0x1d4   : > { %v1495_v51 = vpop.permute.xlu0 %1494 }
 0x1d5   : > { %v1497_v54 = vunpack.i.h.bf16 %v1495_v51  ;;  %v1496_v55 = vunpack.i.l.bf16 %v1495_v51  ;;  %v783_v61 = vsel %vm631_vm8, %v735_v12, %v1491_v53  ;;  %v784_v62 = vsel %vm631_vm8, %v729_v39, %v1492_v52 }
 0x1d7   : > { %v1505_v56 = vpop.permute.xlu1 %1504  ;;  %v781_v5 = vsel %vm631_vm8, %v733_v60, %v1496_v55  ;;  %v782_v46 = vsel %vm631_vm8, %v731_v49, %v1497_v54 }
 0x1d8   : > { %v1507_v57 = vunpack.i.h.bf16 %v1505_v56  ;;  %v1506_v58 = vunpack.i.l.bf16 %v1505_v56  ;;  %v1500_v59 = vpop.permute.xlu0 %1499 }
 0x1d9   : > { %v1502_v63 = vunpack.i.h.bf16 %v1500_v59  ;;  %v1501_v0 = vunpack.i.l.bf16 %v1500_v59 }
 0x1da   : > { %v789_v3 = vsel %vm785_vm15, %v784_v62, %v1507_v57  ;;  %v788_v4 = vsel %vm785_vm15, %v783_v61, %v1506_v58 }
 0x1db   : > { %v791_v6 = vpack.c.bf16 %v789_v3, %v788_v4  ;;  %v786_v7 = vsel %vm785_vm15, %v781_v5, %v1501_v0  ;;  %v787_v41 = vsel %vm785_vm15, %v782_v46, %v1502_v63 }
 0x1dc   : > { %v790_v8 = vpack.c.bf16 %v787_v41, %v786_v7  ;;  %v892_v7 = vld [vmem:[%s1904_s5] sm:$0xf]  ;;  %v1535_v41 = vld [vmem:[%s1908_s9 + $0x10] sm:$0xff]  }
 0x1de   : > { %1417 = vmatprep.mubr.msk.bf16.mxu1 %vm807_vm1, %v790_v8  ;;  %v1368_v8 = vld [vmem:[%s1907_s8] ss:$0 sm:$0xff] }
 0x1df   : > { %1418 = vmatmul.mubr.msk.bf16.vlgmr.msra.gmra.mxu1 %vm807_vm1, %v791_v6 }
 0x1e0   : > { %1428 = vmatpush3.bf16.msra.mxu1 %v1039_v30  ;;  %1431 = vmatprep.mubr.msk.bf16.mxu1 %vm1550_vm7, %v1549_v9 }
 0x1e1   : > { %1429 = vmatprep.subr.bf16.mxu1 %v1549_v9 }
 0x1e4   : > { %1430 = vmatpush3.bf16.msra.mxu1 %v1534_v36 }
 0x1e5   : > { %1445 = vmatprep.subr.bf16.mxu1 %v1549_v9 }
 0x29f   : > { %v1419_v11 = vpop.f32.mrf.mxu1 }
 0x2a0   : > { %v861_v13 = vadd.f32 %v1419_v11, %v1362_v10 }
 0x2a1   : > { %v852_v14 = vpop.f32.mrf.mxu1 }
 0x2a2   : > { %vm869_vm3 = vcmp.gt.f32.partialorder %v861_v13, 0.0  ;;  %v873_v15 = vmul.f32 0.2, %v861_v13  ;;  %v853_v16 = vadd.f32 %v1362_v10, %v852_v14 }
 0x2a3   : > { %v1420_v17 = vpop.f32.mrf.mxu1 }
 0x2a4   : > { %v877_v18 = vsel %vm869_vm3, %v861_v13, %v873_v15  ;;  %vm867_vm4 = vcmp.gt.f32.partialorder %v853_v16, 0.0  ;;  %v871_v19 = vmul.f32 0.2, %v853_v16  ;;  %v864_v21 = vadd.f32 %v1420_v17, %v1362_v10  ;;  %v1536_v13 = vld [vmem:[%s1908_s9 + $0x8] sm:$0xff]  }
 0x2a5   : > { %881 = vst.msk [vmem:[#allocation2 + $0x10] sm:$0xff] %vm631_vm8, %v877_v18  ;;  %v855_v22 = vpop.f32.mrf.mxu1 }
 0x2a6   : > { %v875_v23 = vsel %vm867_vm4, %v853_v16, %v871_v19  ;;  %vm870_vm5 = vcmp.gt.f32.partialorder %v864_v21, 0.0  ;;  %v874_v24 = vmul.f32 0.2, %v864_v21  ;;  %v856_v25 = vadd.f32 %v1362_v10, %v855_v22 }
 0x2a7   : > { %879 = vst.msk [vmem:[#allocation2] sm:$0xff] %vm631_vm8, %v875_v23 }
 0x2a8   : > { %v878_v26 = vsel %vm870_vm5, %v864_v21, %v874_v24  ;;  %vm868_vm6 = vcmp.gt.f32.partialorder %v856_v25, 0.0  ;;  %v872_v27 = vmul.f32 0.2, %v856_v25  ;;  %v1537_v21 = vld [vmem:[%s1908_s9] sm:$0xff]  }
 0x2a9   : > { %882 = vst.msk [vmem:[#allocation2 + $0x18] sm:$0xff] %vm631_vm8, %v878_v26 }
 0x2aa   : > { %v876_v28 = vsel %vm868_vm6, %v856_v25, %v872_v27  ;;  %v1551_v25 = vmov 0  }
 0x2ab   : > { %880 = vst.msk [vmem:[#allocation2 + $0x8] sm:$0xff] %vm631_vm8, %v876_v28  ;;  %1528 = vset.pattern.permute.xlu0 %v1551_v25  ;;  %1529 = vset.pattern.permute.xlu1 %v1551_v25 }
 0x2b0   : > { %v885_v31 = vld [vmem:[#allocation2 + $0x10] ss:$2 sm:$0xff]  ;;  %v889_v32 = vld [vmem:[#allocation2 + $0x11] ss:$2 sm:$0xff] }
 0x2b1   : > { %v891_v35 = vadd.f32 %v889_v32, %v885_v31 }
 0x2b2   : > { %v883_v37 = vld [vmem:[#allocation2] ss:$2 sm:$0xff]  ;;  %v887_v38 = vld [vmem:[#allocation2 + $0x1] ss:$2 sm:$0xff] }
 0x2b3   : > { %v890_v39 = vadd.f32 %v887_v38, %v883_v37  ;;  %v990_v42 = vrot.slane %v891_v35, 1  ;;  %v980_v43 = vrot.slane %v891_v35, 7 }
 0x2b5   : > { %v1508_v44 = vpack.i.bf16 %v891_v35, %v890_v39  ;;  %v893_v45 = vpack.c.bf16 %v891_v35, %v890_v39  ;;  %v989_v47 = vrot.slane %v890_v39, 1  ;;  %v979_v48 = vrot.slane %v890_v39, 7  ;;  %v894_v35 = vld [vmem:[%s1905_s6] sm:$0xff] }
 0x2b7   : > { %1509 = vrot.lane.b32.xlu0 %v1508_v44, %s1547_s23  ;;  %v904_v49 = vsel %vm631_vm8, %v893_v45, 0  ;;  %v991_v50 = vsel %vm577_vm0, %v989_v47, %v990_v42  ;;  %v992_v20 = vsel %vm577_vm0, %v990_v42, %v989_v47  ;;  %v981_v51 = vsel %vm556_vm2, %v979_v48, %v980_v43 }
 0x2b8   : > { %1422 = vmatpush3.bf16.xpose.msra.mxu0 %v904_v49  ;;  %v997_v52 = vsel %vm1780_vm9, 0.0, %v991_v50  ;;  %v998_v53 = vsel %vm1784_vm10, 0.0, %v992_v20  ;;  %v982_v54 = vsel %vm556_vm2, %v980_v43, %v979_v48  ;;  %v988_v62 = vsel %vm1809_vm12, 0.0, %v981_v51 }
 0x2b9   : > { %v1513_v55 = vpack.i.bf16 %v998_v53, %v997_v52  ;;  %1435 = vmatprep.subr.bf16.mxu0 %v1549_v9  ;;  %v987_v61 = vsel %vm1805_vm11, 0.0, %v982_v54 }
 0x2bb   : > { %1514 = vrot.lane.b32.xlu1 %v1513_v55, %s1548_s16  ;;  %v1212_v55 = vld [vmem:[%s1911_s12] sm:$0xff] }
 0x2bf   : > { %1424 = vmatmul.mubr.msk.bf16.vlgmr.msra.gmra.mxu0 %vm631_vm8, %v892_v7 }
 0x2c0   : > { %1436 = vmatpush3.bf16.msra.mxu0 %v1535_v41  ;;  %1441 = vmatprep.mubr.msk.bf16.mxu0 %vm1550_vm7, %v1549_v9  ;;  %v1210_v41 = vld [vmem:[%s1910_s11] sm:$0xf] }
 0x2c1   : > { %1437 = vmatprep.subr.bf16.mxu0 %v1549_v9 }
 0x2c4   : > { %1438 = vmatpush3.bf16.msra.mxu0 %v1536_v13 }
 0x2c5   : > { %1439 = vmatprep.subr.bf16.mxu0 %v1549_v9 }
 0x2c8   : > { %1440 = vmatpush3.bf16.msra.mxu0 %v1537_v21 }
 0x329   : > { %v1510_v56 = vpop.permute.xlu0 %1509 }
 0x32a   : > { %v1512_v58 = vunpack.i.h.bf16 %v1510_v56  ;;  %v1511_v59 = vunpack.i.l.bf16 %v1510_v56  ;;  %v1372_v56 = vld [vmem:[%s1909_s10] ss:$0 sm:$0xff] }
 0x32c   : > { %v1015_v3 = vsel %vm631_vm8, %v987_v61, %v1511_v59  ;;  %v1016_v4 = vsel %vm631_vm8, %v988_v62, %v1512_v58 }
 0x32d   : > { %v1515_v60 = vpop.permute.xlu1 %1514 }
 0x32e   : > { %v1517_v63 = vunpack.i.h.bf16 %v1515_v60  ;;  %v1516_v0 = vunpack.i.l.bf16 %v1515_v60 }
 0x330   : > { %v1017_v5 = vsel %vm785_vm15, %v1015_v3, %v1516_v0  ;;  %v1018_v46 = vsel %vm785_vm15, %v1016_v4, %v1517_v63 }
 0x331   : > { %v1019_v6 = vpack.c.bf16 %v1018_v46, %v1017_v5 }
 0x333   : > { %1432 = vmatmul.mubr.msk.bf16.vlgmr.msra.gmra.mxu1 %vm807_vm1, %v1019_v6 }
 0x334   : > { %1447 = vmatprep.mubr.msk.bf16.mxu1 %vm1550_vm7, %v1549_v9 }
 0x37f   : > { %v940_v37 = vpop.f32.mrf.mxu0 }
 0x381   : > { %v1425_v38 = vpop.f32.mrf.mxu0 }
 0x383   : > { %v943_v1 = vpop.f32.mrf.mxu0 }
 0x385   : > { %v1426_v39 = vpop.f32.mrf.mxu0 }
 0x3f3   : > { %v1075_v10 = vpop.f32.mrf.mxu1 }
 0x3f4   : > { %v1076_v11 = vadd.f32 %v1368_v8, %v1075_v10 }
 0x3f5   : > { %v1433_v14 = vpop.f32.mrf.mxu1 }
 0x3f6   : > { %vm1082_vm13 = vcmp.gt.f32.partialorder %v1076_v11, 0.0  ;;  %v1084_v15 = vmul.f32 0.2, %v1076_v11 }
 0x3f7   : > { %v1078_v16 = vpop.f32.mrf.mxu1 }
 0x3f8   : > { %v1079_v17 = vadd.f32 %v1368_v8, %v1078_v16  ;;  %v1086_v18 = vsel %vm1082_vm13, %v1076_v11, %v1084_v15 }
 0x3f9   : > { %v1434_v19 = vpop.f32.mrf.mxu1  ;;  %v1095_v23 = vrot.slane %v1086_v18, 7  ;;  %v1101_v26 = vrot.slane %v1086_v18, 1 }
 0x3fa   : > { %vm1083_vm14 = vcmp.gt.f32.partialorder %v1079_v17, 0.0  ;;  %v1085_v22 = vmul.f32 0.2, %v1079_v17 }
 0x3fc   : > { %v1087_v24 = vsel %vm1083_vm14, %v1079_v17, %v1085_v22 }
 0x3fd   : > { %v1096_v27 = vrot.slane %v1087_v24, 7  ;;  %v1102_v28 = vrot.slane %v1087_v24, 1  ;;  %v1518_v29 = vpack.i.bf16 %v1087_v24, %v1086_v18 }
 0x3ff   : > { %1519 = vrot.lane.b32.xlu0 %v1518_v29, %s1548_s16  ;;  %v1103_v9 = vsel %vm577_vm0, %v1101_v26, %v1102_v28  ;;  %v1104_v30 = vsel %vm577_vm0, %v1102_v28, %v1101_v26  ;;  %v1097_v31 = vsel %vm556_vm2, %v1095_v23, %v1096_v27  ;;  %v1098_v32 = vsel %vm556_vm2, %v1096_v27, %v1095_v23 }
 0x400   : > { %v1105_v33 = vsel %vm1780_vm9, 0.0, %v1103_v9  ;;  %v1106_v34 = vsel %vm1784_vm10, 0.0, %v1104_v30  ;;  %vm1125_vm0 = vcmask 261120   ;;  %v1099_v44 = vsel %vm1805_vm11, 0.0, %v1098_v32 }
 0x401   : > { %v1523_v36 = vpack.i.bf16 %v1106_v34, %v1105_v33  ;;  %v1100_v45 = vsel %vm1809_vm12, 0.0, %v1097_v31  ;;  %vm1153_vm2 = vcmask 392192  }
 0x403   : > { %1524 = vrot.lane.b32.xlu1 %v1523_v36, %s1552_s21  ;;  %897 = vperm.xlu0 %1528, %v894_v35  }
 0x407   : > { %1215 = vperm.xlu1 %1529, %v1212_v55  }
 0x471   : > { %v1520_v42 = vpop.permute.xlu0 %1519 }
 0x472   : > { %v1522_v43 = vunpack.i.h.bf16 %v1520_v42  ;;  %v1521_v2 = vunpack.i.l.bf16 %v1520_v42 }
 0x474   : > { %v1123_v49 = vsel %vm785_vm15, %v1099_v44, %v1521_v2  ;;  %v1124_v50 = vsel %vm785_vm15, %v1100_v45, %v1522_v43 }
 0x475   : > { %v1525_v40 = vpop.permute.xlu1 %1524 }
 0x476   : > { %v1527_v47 = vunpack.i.h.bf16 %v1525_v40  ;;  %v1526_v48 = vunpack.i.l.bf16 %v1525_v40 }
 0x478   : > { %v1126_v20 = vsel %vm1125_vm0, %v1123_v49, %v1526_v48  ;;  %v1127_v51 = vsel %vm1125_vm0, %v1124_v50, %v1527_v47 }
 0x479   : > { %v1128_v52 = vpack.c.bf16 %v1127_v51, %v1126_v20 }
 0x47b   : > { %1442 = vmatmul.mubr.msk.bf16.vlgmr.msra.gmra.mxu0 %vm1153_vm2, %v1128_v52 }
 0x47e   : > { %v898_v53 = vpop.permute.xlu0 %897 }
 0x47f   : > { %v941_v54 = vadd.f32 %v940_v37, %v898_v53 }
 0x481   : > { %946 = vst.msk [vmem:[%s474_s25] sm:$0xff] %vm785_vm15, %v941_v54 }
 0x482   : > { %v1216_v8 = vpop.permute.xlu1 %1215 }
 0x53b   : > { %v1191_v12 = vpop.f32.mrf.mxu0 }
 0x53c   : > { %v1192_v57 = vadd.f32 %v1372_v56, %v1191_v12 }
 0x53d   : > { %v1443_v58 = vpop.f32.mrf.mxu0 }
 0x53e   : > { %vm1198_vm1 = vcmp.gt.f32.partialorder %v1192_v57, 0.0  ;;  %v1200_v59 = vmul.f32 0.2, %v1192_v57 }
 0x53f   : > { %v1194_v60 = vpop.f32.mrf.mxu0 }
 0x540   : > { %v1202_v61 = vsel %vm1198_vm1, %v1192_v57, %v1200_v59  ;;  %v1195_v62 = vadd.f32 %v1372_v56, %v1194_v60 }
 0x541   : > { %1204 = vst.msk [vmem:[#allocation3] sm:$0xff] %vm785_vm15, %v1202_v61  ;;  %v1444_v63 = vpop.f32.mrf.mxu0 }
 0x542   : > { %vm1199_vm3 = vcmp.gt.f32.partialorder %v1195_v62, 0.0  ;;  %v1201_v0 = vmul.f32 0.2, %v1195_v62 }
 0x544   : > { %v1203_v3 = vsel %vm1199_vm3, %v1195_v62, %v1201_v0 }
 0x545   : > { %1205 = vst.msk [vmem:[#allocation3 + $0x8] sm:$0xff] %vm785_vm15, %v1203_v3 }
 0x54c   : > { %v1206_v4 = vld [vmem:[#allocation3] ss:$2 sm:$0xff]  ;;  %v1208_v5 = vld [vmem:[#allocation3 + $0x1] ss:$2 sm:$0xff] }
 0x54d   : > { %v1209_v46 = vadd.f32 %v1208_v5, %v1206_v4 }
 0x54f   : > { %v1211_v6 = vpack.c.bf16 %v1209_v46, %v1209_v46 }
 0x551   : > { %v1222_v7 = vsel %vm785_vm15, %v1211_v6, 0 }
 0x552   : > { %1446 = vmatpush3.bf16.xpose.msra.mxu1 %v1222_v7 }
 0x559   : > { %1448 = vmatmul.mubr.msk.bf16.vlgmr.msra.gmra.mxu1 %vm785_vm15, %v1210_v41 }
 0x619   : > { %v1258_v10 = vpop.f32.mrf.mxu1 }
 0x61a   : > { %v1259_v11 = vadd.f32 %v1258_v10, %v1216_v8 }
 0x61b   : > { %v1449_v13 = vpop.f32.mrf.mxu1 }
 0x61c   : > { %1264 = vst.msk [vmem:[%s478_s20] sm:$0xff] %vm631_vm8, %v1259_v11 }
 0x61d   : > { %v1261_v14 = vpop.f32.mrf.mxu1 }
 0x61f   : > { %v1450_v15 = vpop.f32.mrf.mxu1 }
 0x620 PF: > { %s25_s29 = sadd.s32 1, %s1544_s29  }
 0x621   : > { %p22_p5 = scmp.ge.s32.totalorder %s25_s29, 4  }
 0x623   :  { %24 = sbr.rel (!%p22_p5) target bundleno = 1 (0x1), region = 118 }

</bundles_post_ra>
